<compile_context>
chip_gen: v6e
topology: v6e:2x2x1
jax: 0.10.0
libtpu: 0.0.40
codegen_flags: <defaults>
</compile_context>

<pallas_src>
import functools
import math

import jax
import jax.numpy as jnp
from jax.experimental import pallas as pl
from jax.experimental.pallas import tpu as pltpu


# ----------------------------------------------------------------------------
# small helpers
# ----------------------------------------------------------------------------
def _round_up(x, m):
    return ((x + m - 1) // m) * m


def _gelu_exact(x):
    # PyTorch nn.GELU() default (exact erf).  erf is evaluated in f32 (the
    # polynomial is upcast anyway); surrounding muls/adds stay in x.dtype.
    erf = jax.lax.erf(x.astype(jnp.float32) * (1.0 / math.sqrt(2.0)))
    return 0.5 * x * (1.0 + erf).astype(x.dtype)


def _gelu_tanh(x):
    # tanh approximation (routes the transcendental to the EUP slot).
    return jax.nn.gelu(x, approximate=True)


def _const_index_map(rank):
    return lambda i: (0,) * rank


@functools.lru_cache(maxsize=None)
def _buffered_weight_specs_supported():
    """Does this Pallas build accept pipeline_mode=pl.Buffered(1) on a BlockSpec?"""
    if not hasattr(pl, "Buffered"):
        return False
    try:
        pl.BlockSpec((8, 128), lambda i: (0, 0), pipeline_mode=pl.Buffered(1))
        return True
    except Exception:  # construction-time rejection only
        return False


@functools.lru_cache(maxsize=None)
def _vmem_capacity_bytes():
    try:
        return int(pltpu.get_tpu_info().vmem_capacity_bytes)
    except Exception:
        return 64 * 2**20  # conservative: v7x per-TensorCore VMEM


@functools.lru_cache(maxsize=None)
def _default_elementwise_dtype():
    """bf16 bias+GELU on chips with a bf16 VPU/EUP (v6e/v7x); f32 otherwise."""
    try:
        kind = jax.devices()[0].device_kind.lower()
    except Exception:
        return jnp.float32
    if any(v in kind for v in ("v2", "v3", "v4", "v5")):
        return jnp.float32
    return jnp.bfloat16


# ----------------------------------------------------------------------------
# kernel
# ----------------------------------------------------------------------------
def _mlp_big_kernel(x_ref,
                    w_in_ref, b_in_ref,
                    w_mid_ref, b_mid_ref,
                    w_out_ref, b_out_ref,
                    o_ref, *, approximate_gelu, elementwise_dtype):
    gelu = _gelu_tanh if approximate_gelu else _gelu_exact
    cdt = w_in_ref.dtype       # matmul-input dtype (bf16 by default)
    ew = elementwise_dtype     # bias+GELU dtype (bf16 on v6e/v7x, f32 on v5e)

    def fused_stage(h_c, w, b):
        acc = jnp.dot(h_c, w, preferred_element_type=jnp.float32)
        acc = acc.astype(ew) + b.astype(ew)
        return gelu(acc)

    # Input layer (cast x from its native dtype right before the matmul).
    h = fused_stage(x_ref[...].astype(cdt), w_in_ref[...], b_in_ref[...])
    # Five hidden stages (statically unrolled; stacked [5, H, H] weights).
    for j in range(w_mid_ref.shape[0]):
        h = fused_stage(h.astype(cdt), w_mid_ref[j], b_mid_ref[j])
    # Output layer: no activation, bias add kept in f32.
    out = jnp.dot(h.astype(cdt), w_out_ref[...],
                  preferred_element_type=jnp.float32) + b_out_ref[...]
    o_ref[...] = out.astype(o_ref.dtype)


# ----------------------------------------------------------------------------
# one-time parameter preparation (hoisted out of the forward pass)
# ----------------------------------------------------------------------------
def prepare_params(params, *, compute_dtype=jnp.bfloat16):
    """Pad hidden dims to lane multiples, cast to the matmul dtype and stack the
    five hidden weights.  Call once at init; the result is reused every forward.
    Zero padding is exact: padded bias = 0 and GELU(0) = 0."""
    in_features = params["w_in"].shape[0]
    hidden = params["w_in"].shape[1]
    out_features = params["w_out"].shape[1]

    h_p = _round_up(hidden, 128)
    # Small/aligned output widths use a full-dim (unpadded) block: the masked
    # store beats 8x write amplification + a post-slice.
    if out_features % 128 == 0 or out_features < 128:
        out_p = out_features
    else:
        out_p = _round_up(out_features, 128)

    def pad_w(w, r, c):
        w = w.astype(compute_dtype)
        return jnp.pad(w, ((0, r - w.shape[0]), (0, c - w.shape[1])))

    def pad_b(b, c):
        b = b.reshape(1, -1).astype(jnp.float32)
        return jnp.pad(b, ((0, 0), (0, c - b.shape[1])))

    return dict(
        in_features=in_features, hidden=hidden, out_features=out_features,
        h_p=h_p, out_p=out_p, compute_dtype=compute_dtype,
        w_in=pad_w(params["w_in"], in_features, h_p),   # K dim stays unpadded
        b_in=pad_b(params["b_in"], h_p),
        w_mid=jnp.stack([pad_w(params[f"w_{k}"], h_p, h_p) for k in "abcde"]),
        b_mid=jnp.stack([pad_b(params[f"b_{k}"], h_p) for k in "abcde"]),
        w_out=pad_w(params["w_out"], h_p, out_p),
        b_out=pad_b(params["b_out"], out_p),
    )


# ----------------------------------------------------------------------------
# forward pass
# ----------------------------------------------------------------------------
def feature_projection_mlp_big(x, prepared, *, tile_m=None,
                               approximate_gelu=False,
                               elementwise_dtype=None):
    """x: [..., in_features] -> [..., out_features].  `prepared` is the output
    of prepare_params (weights already padded / cast / stacked)."""
    in_features = prepared["in_features"]
    out_features = prepared["out_features"]
    h_p = prepared["h_p"]
    out_p = prepared["out_p"]
    compute_dtype = prepared["compute_dtype"]
    if elementwise_dtype is None:
        elementwise_dtype = _default_elementwise_dtype()

    assert x.shape[-1] == in_features
    lead = x.shape[:-1]
    n = math.prod(lead)
    x2 = x.reshape(n, in_features)        # native dtype: no HBM pad/cast of x
    out_dtype = x.dtype

    # ---- row tiling --------------------------------------------------------
    if tile_m is None:
        # Large tiles amortize the ~0.35us/step overhead and the per-step MXU
        # weight pushes when the hidden size is modest.
        tile_m = 1024 if h_p <= 256 else (512 if h_p <= 512 else 256)
    tm = max(8, min(_round_up(tile_m, 8), _round_up(n, 8)))
    # Keep >=2 grid steps when possible so ("parallel",) can shard across both
    # v7x TensorCores.
    if n >= 16 and pl.cdiv(n, tm) < 2:
        tm = _round_up(pl.cdiv(n, 2), 8)
    n_p = _round_up(n, tm)
    grid = (n_p // tm,)

    xp = x2 if n_p == n else jnp.pad(x2, ((0, n_p - n), (0, 0)))

    # ---- VMEM budget -------------------------------------------------------
    cbytes = jnp.dtype(compute_dtype).itemsize
    xbytes = jnp.dtype(x.dtype).itemsize
    obytes = jnp.dtype(out_dtype).itemsize
    weight_bytes = (in_features * h_p + 5 * h_p * h_p + h_p * out_p) * cbytes
    bias_bytes = (6 * h_p + out_p) * 4

    # Single-buffer the grid-invariant weights only when it actually matters.
    single_buffer = ((weight_bytes + bias_bytes) * 2 > 8 * 2**20
                     and _buffered_weight_specs_supported())
    wb = 1 if single_buffer else 2
    need = ((weight_bytes + bias_bytes) * wb                     # resident weights
            + 2 * tm * (in_features * xbytes + out_p * obytes)   # pipelined x/out
            + 6 * tm * h_p * 4)                                  # live f32 temps
    capacity = _vmem_capacity_bytes()
    vmem_cap = min(int(capacity * 0.80), 100 * 2**20)            # headroom for Mosaic
    if need > vmem_cap:
        # TODO(synk): stream w_mid[j] per stage from HBM (pl.ANY + manual double-buffered make_async_copy) when the resident-weight set exceeds VMEM.
        raise ValueError(
            f"FeatureProjectionMLP_big: estimated VMEM need {need / 2**20:.1f} MiB "
            f"exceeds budget {vmem_cap / 2**20:.1f} MiB; reduce tile_m or hidden size.")
    vmem_limit = int(min(vmem_cap, max(32 * 2**20, int(need * 1.3) + (2 << 20))))

    # ---- cost estimate (erf lowers to a VALU polynomial, not the EUP) ------
    cost = pl.CostEstimate(
        flops=2 * n_p * (in_features * h_p + 5 * h_p * h_p + h_p * out_p),
        transcendentals=(6 * n_p * h_p) if approximate_gelu else 0,
        bytes_accessed=(n_p * in_features * xbytes + n_p * out_p * obytes
                        + weight_bytes + bias_bytes))

    kernel = functools.partial(_mlp_big_kernel,
                               approximate_gelu=approximate_gelu,
                               elementwise_dtype=elementwise_dtype)

    def build_and_call(use_single_buffer):
        def wspec(shape):
            idx = _const_index_map(len(shape))
            if use_single_buffer:
                return pl.BlockSpec(shape, idx, pipeline_mode=pl.Buffered(1))
            return pl.BlockSpec(shape, idx)

        return pl.pallas_call(
            kernel,
            out_shape=jax.ShapeDtypeStruct((n_p, out_p), out_dtype),
            grid_spec=pltpu.PrefetchScalarGridSpec(
                num_scalar_prefetch=0,
                grid=grid,
                in_specs=[
                    pl.BlockSpec((tm, in_features), lambda i: (i, 0)),  # x rows
                    wspec((in_features, h_p)), wspec((1, h_p)),         # input layer
                    wspec((5, h_p, h_p)), wspec((5, 1, h_p)),           # 5 hidden
                    wspec((h_p, out_p)), wspec((1, out_p)),             # output layer
                ],
                out_specs=pl.BlockSpec((tm, out_p), lambda i: (i, 0)),
            ),
            compiler_params=pltpu.CompilerParams(
                dimension_semantics=("parallel",),
                vmem_limit_bytes=vmem_limit),
            cost_estimate=cost,
        )(xp, prepared["w_in"], prepared["b_in"], prepared["w_mid"],
          prepared["b_mid"], prepared["w_out"], prepared["b_out"])

    if single_buffer:
        try:
            out2 = build_and_call(True)
        except (TypeError, NotImplementedError, pltpu.LoweringException):
            # Only "Buffered(1) not supported" style rejections fall back to
            # default (double-buffered) weight specs; real errors propagate.
            out2 = build_and_call(False)
    else:
        out2 = build_and_call(False)

    if n_p != n or out_p != out_features:
        out2 = out2[:n, :out_features]
    return out2.reshape(*lead, out_features)


# ----------------------------------------------------------------------------
# PyTorch-style init and pure-JAX reference
# ----------------------------------------------------------------------------
def init_params(key, in_features, out_features, dtype=jnp.float32):
    """PyTorch Linear init U(-1/sqrt(fan_in), +1/sqrt(fan_in)); weights stored
    pre-transposed as [fan_in, fan_out]."""
    hidden = (in_features + out_features) // 2
    dims = [("in", in_features, hidden)] + \
           [(k, hidden, hidden) for k in "abcde"] + \
           [("out", hidden, out_features)]
    params = {}
    for name, fan_in, fan_out in dims:
        key, kw, kb = jax.random.split(key, 3)
        bound = 1.0 / math.sqrt(fan_in)
        params[f"w_{name}"] = jax.random.uniform(
            kw, (fan_in, fan_out), dtype, minval=-bound, maxval=bound)
        params[f"b_{name}"] = jax.random.uniform(
            kb, (1, fan_out), dtype, minval=-bound, maxval=bound)
    return params


def reference_forward(x, params, *, compute_dtype=jnp.float32,
                      elementwise_dtype=jnp.float32, approximate_gelu=False):
    """Pure-JAX reference.  With f32/f32 it matches the PyTorch module; with
    bf16 compute/elementwise it emulates the kernel's mixed-precision path."""
    gelu = _gelu_tanh if approximate_gelu else _gelu_exact
    h = x
    for name in ["in", "a", "b", "c", "d", "e"]:
        w = params[f"w_{name}"].astype(compute_dtype)
        b = params[f"b_{name}"].astype(jnp.float32)[0]
        acc = jnp.dot(h.astype(compute_dtype), w,
                      preferred_element_type=jnp.float32)
        acc = acc.astype(elementwise_dtype) + b.astype(elementwise_dtype)
        h = gelu(acc)
    w = params["w_out"].astype(compute_dtype)
    b = params["b_out"].astype(jnp.float32)[0]
    return (jnp.dot(h.astype(compute_dtype), w,
                    preferred_element_type=jnp.float32) + b).astype(jnp.float32)


# ----------------------------------------------------------------------------
# demo / self-test
# ----------------------------------------------------------------------------
if __name__ == "__main__":
    in_features, out_features = 32, 16
    batch, seq = 2, 8

    key = jax.random.PRNGKey(0)
    key, kx = jax.random.split(key)
    x = jax.random.normal(kx, (batch, seq, in_features), jnp.float32)
    params = init_params(key, in_features, out_features)

    # One-time weight prep (hoisted out of the per-call forward).
    prepared = prepare_params(params)
    ew = _default_elementwise_dtype()

    # 1) Default config: n=16 rows -> tm=8, grid=(2,) (exercises multi-step grid).
    y = jax.block_until_ready(
        feature_projection_mlp_big(x, prepared, elementwise_dtype=ew))
    assert y.shape == (batch, seq, out_features)

    flat = x.reshape(-1, in_features)
    y_ref_mixed = reference_forward(flat, params, compute_dtype=jnp.bfloat16,
                                    elementwise_dtype=ew).reshape(y.shape)
    y_ref_f32 = reference_forward(flat, params).reshape(y.shape)
    assert jnp.allclose(y, y_ref_mixed, atol=2e-2, rtol=2e-2), (
        "kernel vs mixed-precision reference mismatch: "
        f"{float(jnp.max(jnp.abs(y - y_ref_mixed)))}")
    # bf16 matmul/elementwise drifts slightly from the fp32 PyTorch reference.
    assert jnp.allclose(y, y_ref_f32, atol=5e-2, rtol=5e-2)

    # 2) Jitted call (weights closed over), ragged rows (n=15) + explicit small
    #    tile -> row padding path with a 2-step grid.
    x2 = jax.random.normal(jax.random.PRNGKey(1), (3, 5, in_features),
                           jnp.float32)
    fwd = jax.jit(lambda a: feature_projection_mlp_big(
        a, prepared, tile_m=8, elementwise_dtype=ew))
    y2 = jax.block_until_ready(fwd(x2))
    y2_ref = reference_forward(x2.reshape(-1, in_features), params,
                               compute_dtype=jnp.bfloat16,
                               elementwise_dtype=ew).reshape(3, 5, out_features)
    assert y2.shape == (3, 5, out_features)
    assert jnp.allclose(y2, y2_ref, atol=2e-2, rtol=2e-2)

    print("KERNEL_OK")
</pallas_src>

<mosaic_0001>
module attributes {stable_mosaic.version = 11 : i64} {
  func.func @_mlp_big_kernel(%arg0: i32, %arg1: memref<8x32xf32, #tpu.memory_space<vmem>>, %arg2: memref<32x128xbf16, #tpu.memory_space<vmem>>, %arg3: memref<1x128xf32, #tpu.memory_space<vmem>>, %arg4: memref<5x128x128xbf16, #tpu.memory_space<vmem>>, %arg5: memref<5x1x128xf32, #tpu.memory_space<vmem>>, %arg6: memref<128x16xbf16, #tpu.memory_space<vmem>>, %arg7: memref<1x16xf32, #tpu.memory_space<vmem>>, %arg8: memref<8x16xf32, #tpu.memory_space<vmem>>) attributes {dimension_semantics = [#tpu.dimension_semantics<parallel>], iteration_bounds = array<i64: 2>, scalar_prefetch = 0 : i64, scratch_operands = 0 : i64, tpu.core_type = #tpu.core_type<tc>, window_params = [{transform_indices = @transform_0, window_bounds = array<i64: 8, 32>}, {pipeline_mode = #tpu.pipeline_mode<synchronous>, transform_indices = @transform_1, window_bounds = array<i64: 32, 128>}, {pipeline_mode = #tpu.pipeline_mode<synchronous>, transform_indices = @transform_2, window_bounds = array<i64: 1, 128>}, {pipeline_mode = #tpu.pipeline_mode<synchronous>, transform_indices = @transform_3, window_bounds = array<i64: 5, 128, 128>}, {pipeline_mode = #tpu.pipeline_mode<synchronous>, transform_indices = @transform_4, window_bounds = array<i64: 5, 1, 128>}, {pipeline_mode = #tpu.pipeline_mode<synchronous>, transform_indices = @transform_5, window_bounds = array<i64: 128, 16>}, {pipeline_mode = #tpu.pipeline_mode<synchronous>, transform_indices = @transform_6, window_bounds = array<i64: 1, 16>}, {transform_indices = @transform_7, window_bounds = array<i64: 8, 16>}]} {
    %c0 = arith.constant 0 : index
    %c0_0 = arith.constant 0 : index
    %0 = vector.load %arg1[%c0, %c0_0] : memref<8x32xf32, #tpu.memory_space<vmem>>, vector<8x32xf32>
    %1 = arith.truncf %0 : vector<8x32xf32> to vector<8x32xbf16>
    %c0_1 = arith.constant 0 : index
    %c0_2 = arith.constant 0 : index
    %2 = vector.load %arg2[%c0_1, %c0_2] : memref<32x128xbf16, #tpu.memory_space<vmem>>, vector<32x128xbf16>
    %c0_3 = arith.constant 0 : index
    %c0_4 = arith.constant 0 : index
    %3 = vector.load %arg3[%c0_3, %c0_4] : memref<1x128xf32, #tpu.memory_space<vmem>>, vector<1x128xf32>
    %cst = arith.constant dense<0.000000e+00> : vector<8x128xf32>
    %4 = tpu.matmul %1, %2, %cst {dimension_numbers = #tpu.dot_dimension_numbers<[1], [0], [0], [1], [0, 0, 1, 1], [], []>} : vector<8x32xbf16>, vector<32x128xbf16>, vector<8x128xf32> -> vector<8x128xf32>
    %5 = arith.truncf %4 : vector<8x128xf32> to vector<8x128xbf16>
    %6 = arith.truncf %3 : vector<1x128xf32> to vector<1x128xbf16>
    %7 = vector.broadcast %6 : vector<1x128xbf16> to vector<8x128xbf16>
    %8 = arith.addf %5, %7 : vector<8x128xbf16>
    %9 = arith.extf %8 : vector<8x128xbf16> to vector<8x128xf32>
    %cst_5 = arith.constant 0.707106769 : f32
    %10 = vector.broadcast %cst_5 : f32 to vector<8x128xf32>
    %11 = arith.mulf %9, %10 : vector<8x128xf32>
    %12 = math.erf %11 : vector<8x128xf32>
    %cst_6 = arith.constant 5.000000e-01 : bf16
    %13 = vector.broadcast %cst_6 : bf16 to vector<8x128xbf16>
    %14 = arith.mulf %13, %8 : vector<8x128xbf16>
    %cst_7 = arith.constant 1.000000e+00 : f32
    %15 = vector.broadcast %cst_7 : f32 to vector<8x128xf32>
    %16 = arith.addf %15, %12 : vector<8x128xf32>
    %17 = arith.truncf %16 : vector<8x128xf32> to vector<8x128xbf16>
    %18 = arith.mulf %14, %17 : vector<8x128xbf16>
    %c0_8 = arith.constant 0 : index
    %c0_9 = arith.constant 0 : index
    %c0_10 = arith.constant 0 : index
    %19 = vector.load %arg4[%c0_8, %c0_9, %c0_10] : memref<5x128x128xbf16, #tpu.memory_space<vmem>>, vector<1x128x128xbf16>
    %20 = vector.shape_cast %19 : vector<1x128x128xbf16> to vector<128x128xbf16>
    %c0_11 = arith.constant 0 : index
    %c0_12 = arith.constant 0 : index
    %c0_13 = arith.constant 0 : index
    %21 = vector.load %arg5[%c0_11, %c0_12, %c0_13] : memref<5x1x128xf32, #tpu.memory_space<vmem>>, vector<1x1x128xf32>
    %22 = vector.shape_cast %21 : vector<1x1x128xf32> to vector<1x128xf32>
    %cst_14 = arith.constant dense<0.000000e+00> : vector<8x128xf32>
    %23 = tpu.matmul %18, %20, %cst_14 {dimension_numbers = #tpu.dot_dimension_numbers<[1], [0], [0], [1], [0, 0, 1, 1], [], []>} : vector<8x128xbf16>, vector<128x128xbf16>, vector<8x128xf32> -> vector<8x128xf32>
    %24 = arith.truncf %23 : vector<8x128xf32> to vector<8x128xbf16>
    %25 = arith.truncf %22 : vector<1x128xf32> to vector<1x128xbf16>
    %26 = vector.broadcast %25 : vector<1x128xbf16> to vector<8x128xbf16>
    %27 = arith.addf %24, %26 : vector<8x128xbf16>
    %28 = arith.extf %27 : vector<8x128xbf16> to vector<8x128xf32>
    %cst_15 = arith.constant 0.707106769 : f32
    %29 = vector.broadcast %cst_15 : f32 to vector<8x128xf32>
    %30 = arith.mulf %28, %29 : vector<8x128xf32>
    %31 = math.erf %30 : vector<8x128xf32>
    %cst_16 = arith.constant 5.000000e-01 : bf16
    %32 = vector.broadcast %cst_16 : bf16 to vector<8x128xbf16>
    %33 = arith.mulf %32, %27 : vector<8x128xbf16>
    %cst_17 = arith.constant 1.000000e+00 : f32
    %34 = vector.broadcast %cst_17 : f32 to vector<8x128xf32>
    %35 = arith.addf %34, %31 : vector<8x128xf32>
    %36 = arith.truncf %35 : vector<8x128xf32> to vector<8x128xbf16>
    %37 = arith.mulf %33, %36 : vector<8x128xbf16>
    %c1 = arith.constant 1 : index
    %c0_18 = arith.constant 0 : index
    %c0_19 = arith.constant 0 : index
    %38 = vector.load %arg4[%c1, %c0_18, %c0_19] : memref<5x128x128xbf16, #tpu.memory_space<vmem>>, vector<1x128x128xbf16>
    %39 = vector.shape_cast %38 : vector<1x128x128xbf16> to vector<128x128xbf16>
    %c1_20 = arith.constant 1 : index
    %c0_21 = arith.constant 0 : index
    %c0_22 = arith.constant 0 : index
    %40 = vector.load %arg5[%c1_20, %c0_21, %c0_22] : memref<5x1x128xf32, #tpu.memory_space<vmem>>, vector<1x1x128xf32>
    %41 = vector.shape_cast %40 : vector<1x1x128xf32> to vector<1x128xf32>
    %cst_23 = arith.constant dense<0.000000e+00> : vector<8x128xf32>
    %42 = tpu.matmul %37, %39, %cst_23 {dimension_numbers = #tpu.dot_dimension_numbers<[1], [0], [0], [1], [0, 0, 1, 1], [], []>} : vector<8x128xbf16>, vector<128x128xbf16>, vector<8x128xf32> -> vector<8x128xf32>
    %43 = arith.truncf %42 : vector<8x128xf32> to vector<8x128xbf16>
    %44 = arith.truncf %41 : vector<1x128xf32> to vector<1x128xbf16>
    %45 = vector.broadcast %44 : vector<1x128xbf16> to vector<8x128xbf16>
    %46 = arith.addf %43, %45 : vector<8x128xbf16>
    %47 = arith.extf %46 : vector<8x128xbf16> to vector<8x128xf32>
    %cst_24 = arith.constant 0.707106769 : f32
    %48 = vector.broadcast %cst_24 : f32 to vector<8x128xf32>
    %49 = arith.mulf %47, %48 : vector<8x128xf32>
    %50 = math.erf %49 : vector<8x128xf32>
    %cst_25 = arith.constant 5.000000e-01 : bf16
    %51 = vector.broadcast %cst_25 : bf16 to vector<8x128xbf16>
    %52 = arith.mulf %51, %46 : vector<8x128xbf16>
    %cst_26 = arith.constant 1.000000e+00 : f32
    %53 = vector.broadcast %cst_26 : f32 to vector<8x128xf32>
    %54 = arith.addf %53, %50 : vector<8x128xf32>
    %55 = arith.truncf %54 : vector<8x128xf32> to vector<8x128xbf16>
    %56 = arith.mulf %52, %55 : vector<8x128xbf16>
    %c2 = arith.constant 2 : index
    %c0_27 = arith.constant 0 : index
    %c0_28 = arith.constant 0 : index
    %57 = vector.load %arg4[%c2, %c0_27, %c0_28] : memref<5x128x128xbf16, #tpu.memory_space<vmem>>, vector<1x128x128xbf16>
    %58 = vector.shape_cast %57 : vector<1x128x128xbf16> to vector<128x128xbf16>
    %c2_29 = arith.constant 2 : index
    %c0_30 = arith.constant 0 : index
    %c0_31 = arith.constant 0 : index
    %59 = vector.load %arg5[%c2_29, %c0_30, %c0_31] : memref<5x1x128xf32, #tpu.memory_space<vmem>>, vector<1x1x128xf32>
    %60 = vector.shape_cast %59 : vector<1x1x128xf32> to vector<1x128xf32>
    %cst_32 = arith.constant dense<0.000000e+00> : vector<8x128xf32>
    %61 = tpu.matmul %56, %58, %cst_32 {dimension_numbers = #tpu.dot_dimension_numbers<[1], [0], [0], [1], [0, 0, 1, 1], [], []>} : vector<8x128xbf16>, vector<128x128xbf16>, vector<8x128xf32> -> vector<8x128xf32>
    %62 = arith.truncf %61 : vector<8x128xf32> to vector<8x128xbf16>
    %63 = arith.truncf %60 : vector<1x128xf32> to vector<1x128xbf16>
    %64 = vector.broadcast %63 : vector<1x128xbf16> to vector<8x128xbf16>
    %65 = arith.addf %62, %64 : vector<8x128xbf16>
    %66 = arith.extf %65 : vector<8x128xbf16> to vector<8x128xf32>
    %cst_33 = arith.constant 0.707106769 : f32
    %67 = vector.broadcast %cst_33 : f32 to vector<8x128xf32>
    %68 = arith.mulf %66, %67 : vector<8x128xf32>
    %69 = math.erf %68 : vector<8x128xf32>
    %cst_34 = arith.constant 5.000000e-01 : bf16
    %70 = vector.broadcast %cst_34 : bf16 to vector<8x128xbf16>
    %71 = arith.mulf %70, %65 : vector<8x128xbf16>
    %cst_35 = arith.constant 1.000000e+00 : f32
    %72 = vector.broadcast %cst_35 : f32 to vector<8x128xf32>
    %73 = arith.addf %72, %69 : vector<8x128xf32>
    %74 = arith.truncf %73 : vector<8x128xf32> to vector<8x128xbf16>
    %75 = arith.mulf %71, %74 : vector<8x128xbf16>
    %c3 = arith.constant 3 : index
    %c0_36 = arith.constant 0 : index
    %c0_37 = arith.constant 0 : index
    %76 = vector.load %arg4[%c3, %c0_36, %c0_37] : memref<5x128x128xbf16, #tpu.memory_space<vmem>>, vector<1x128x128xbf16>
    %77 = vector.shape_cast %76 : vector<1x128x128xbf16> to vector<128x128xbf16>
    %c3_38 = arith.constant 3 : index
    %c0_39 = arith.constant 0 : index
    %c0_40 = arith.constant 0 : index
    %78 = vector.load %arg5[%c3_38, %c0_39, %c0_40] : memref<5x1x128xf32, #tpu.memory_space<vmem>>, vector<1x1x128xf32>
    %79 = vector.shape_cast %78 : vector<1x1x128xf32> to vector<1x128xf32>
    %cst_41 = arith.constant dense<0.000000e+00> : vector<8x128xf32>
    %80 = tpu.matmul %75, %77, %cst_41 {dimension_numbers = #tpu.dot_dimension_numbers<[1], [0], [0], [1], [0, 0, 1, 1], [], []>} : vector<8x128xbf16>, vector<128x128xbf16>, vector<8x128xf32> -> vector<8x128xf32>
    %81 = arith.truncf %80 : vector<8x128xf32> to vector<8x128xbf16>
    %82 = arith.truncf %79 : vector<1x128xf32> to vector<1x128xbf16>
    %83 = vector.broadcast %82 : vector<1x128xbf16> to vector<8x128xbf16>
    %84 = arith.addf %81, %83 : vector<8x128xbf16>
    %85 = arith.extf %84 : vector<8x128xbf16> to vector<8x128xf32>
    %cst_42 = arith.constant 0.707106769 : f32
    %86 = vector.broadcast %cst_42 : f32 to vector<8x128xf32>
    %87 = arith.mulf %85, %86 : vector<8x128xf32>
    %88 = math.erf %87 : vector<8x128xf32>
    %cst_43 = arith.constant 5.000000e-01 : bf16
    %89 = vector.broadcast %cst_43 : bf16 to vector<8x128xbf16>
    %90 = arith.mulf %89, %84 : vector<8x128xbf16>
    %cst_44 = arith.constant 1.000000e+00 : f32
    %91 = vector.broadcast %cst_44 : f32 to vector<8x128xf32>
    %92 = arith.addf %91, %88 : vector<8x128xf32>
    %93 = arith.truncf %92 : vector<8x128xf32> to vector<8x128xbf16>
    %94 = arith.mulf %90, %93 : vector<8x128xbf16>
    %c4 = arith.constant 4 : index
    %c0_45 = arith.constant 0 : index
    %c0_46 = arith.constant 0 : index
    %95 = vector.load %arg4[%c4, %c0_45, %c0_46] : memref<5x128x128xbf16, #tpu.memory_space<vmem>>, vector<1x128x128xbf16>
    %96 = vector.shape_cast %95 : vector<1x128x128xbf16> to vector<128x128xbf16>
    %c4_47 = arith.constant 4 : index
    %c0_48 = arith.constant 0 : index
    %c0_49 = arith.constant 0 : index
    %97 = vector.load %arg5[%c4_47, %c0_48, %c0_49] : memref<5x1x128xf32, #tpu.memory_space<vmem>>, vector<1x1x128xf32>
    %98 = vector.shape_cast %97 : vector<1x1x128xf32> to vector<1x128xf32>
    %cst_50 = arith.constant dense<0.000000e+00> : vector<8x128xf32>
    %99 = tpu.matmul %94, %96, %cst_50 {dimension_numbers = #tpu.dot_dimension_numbers<[1], [0], [0], [1], [0, 0, 1, 1], [], []>} : vector<8x128xbf16>, vector<128x128xbf16>, vector<8x128xf32> -> vector<8x128xf32>
    %100 = arith.truncf %99 : vector<8x128xf32> to vector<8x128xbf16>
    %101 = arith.truncf %98 : vector<1x128xf32> to vector<1x128xbf16>
    %102 = vector.broadcast %101 : vector<1x128xbf16> to vector<8x128xbf16>
    %103 = arith.addf %100, %102 : vector<8x128xbf16>
    %104 = arith.extf %103 : vector<8x128xbf16> to vector<8x128xf32>
    %cst_51 = arith.constant 0.707106769 : f32
    %105 = vector.broadcast %cst_51 : f32 to vector<8x128xf32>
    %106 = arith.mulf %104, %105 : vector<8x128xf32>
    %107 = math.erf %106 : vector<8x128xf32>
    %cst_52 = arith.constant 5.000000e-01 : bf16
    %108 = vector.broadcast %cst_52 : bf16 to vector<8x128xbf16>
    %109 = arith.mulf %108, %103 : vector<8x128xbf16>
    %cst_53 = arith.constant 1.000000e+00 : f32
    %110 = vector.broadcast %cst_53 : f32 to vector<8x128xf32>
    %111 = arith.addf %110, %107 : vector<8x128xf32>
    %112 = arith.truncf %111 : vector<8x128xf32> to vector<8x128xbf16>
    %113 = arith.mulf %109, %112 : vector<8x128xbf16>
    %c0_54 = arith.constant 0 : index
    %c0_55 = arith.constant 0 : index
    %114 = vector.load %arg6[%c0_54, %c0_55] : memref<128x16xbf16, #tpu.memory_space<vmem>>, vector<128x16xbf16>
    %cst_56 = arith.constant dense<0.000000e+00> : vector<8x16xf32>
    %115 = tpu.matmul %113, %114, %cst_56 {dimension_numbers = #tpu.dot_dimension_numbers<[1], [0], [0], [1], [0, 0, 1, 1], [], []>} : vector<8x128xbf16>, vector<128x16xbf16>, vector<8x16xf32> -> vector<8x16xf32>
    %c0_57 = arith.constant 0 : index
    %c0_58 = arith.constant 0 : index
    %116 = vector.load %arg7[%c0_57, %c0_58] : memref<1x16xf32, #tpu.memory_space<vmem>>, vector<1x16xf32>
    %117 = vector.broadcast %116 : vector<1x16xf32> to vector<8x16xf32>
    %118 = arith.addf %115, %117 : vector<8x16xf32>
    %c0_59 = arith.constant 0 : index
    %c0_60 = arith.constant 0 : index
    %119 = vector.load %arg8[%c0_59, %c0_60] : memref<8x16xf32, #tpu.memory_space<vmem>>, vector<8x16xf32>
    tpu.vector_store %arg8[%c0_59, %c0_60], %118 {strides = array<i32>} : memref<8x16xf32, #tpu.memory_space<vmem>>, vector<8x16xf32>,
    return
  }
  func.func @transform_0(%arg0: i32) -> (i32, i32) {
    %c0_i32 = arith.constant 0 : i32
    %c0_i32_0 = arith.constant 0 : i32
    return %arg0, %c0_i32 : i32, i32
  }
  func.func @transform_1(%arg0: i32) -> (i32, i32) {
    %c0_i32 = arith.constant 0 : i32
    %c0_i32_0 = arith.constant 0 : i32
    %c0_i32_1 = arith.constant 0 : i32
    return %c0_i32, %c0_i32_0 : i32, i32
  }
  func.func @transform_2(%arg0: i32) -> (i32, i32) {
    %c0_i32 = arith.constant 0 : i32
    %c0_i32_0 = arith.constant 0 : i32
    %c0_i32_1 = arith.constant 0 : i32
    return %c0_i32, %c0_i32_0 : i32, i32
  }
  func.func @transform_3(%arg0: i32) -> (i32, i32, i32) {
    %c0_i32 = arith.constant 0 : i32
    %c0_i32_0 = arith.constant 0 : i32
    %c0_i32_1 = arith.constant 0 : i32
    %c0_i32_2 = arith.constant 0 : i32
    return %c0_i32, %c0_i32_0, %c0_i32_1 : i32, i32, i32
  }
  func.func @transform_4(%arg0: i32) -> (i32, i32, i32) {
    %c0_i32 = arith.constant 0 : i32
    %c0_i32_0 = arith.constant 0 : i32
    %c0_i32_1 = arith.constant 0 : i32
    %c0_i32_2 = arith.constant 0 : i32
    return %c0_i32, %c0_i32_0, %c0_i32_1 : i32, i32, i32
  }
  func.func @transform_5(%arg0: i32) -> (i32, i32) {
    %c0_i32 = arith.constant 0 : i32
    %c0_i32_0 = arith.constant 0 : i32
    %c0_i32_1 = arith.constant 0 : i32
    return %c0_i32, %c0_i32_0 : i32, i32
  }
  func.func @transform_6(%arg0: i32) -> (i32, i32) {
    %c0_i32 = arith.constant 0 : i32
    %c0_i32_0 = arith.constant 0 : i32
    %c0_i32_1 = arith.constant 0 : i32
    return %c0_i32, %c0_i32_0 : i32, i32
  }
  func.func @transform_7(%arg0: i32) -> (i32, i32) {
    %c0_i32 = arith.constant 0 : i32
    %c0_i32_0 = arith.constant 0 : i32
    return %arg0, %c0_i32 : i32, i32
  }
}

</mosaic_0001>

<bundles_post_ra>
// kernel: tpu_custom_call.1
= control target key start
LH: loop header
LB: loop body
LE: loop exit
PB: predicated region body
PF: predicated region fallthrough
CT: control target
= control target key end

     0   :  { %12 = vsyncpa [#allocation3], 0  ;;  %s1934_s0 = inlined_call_operand.vmem [shape: f32[16,32], index: 0, kind: input, shape index: {}]   ;;  %s1935_s1 = inlined_call_operand.vmem [shape: bf16[32,128], index: 1, kind: input, shape index: {}]   ;;  %s1936_s2 = inlined_call_operand.vmem [shape: f32[1,128], index: 2, kind: input, shape index: {}]   ;;  %s1937_s3 = inlined_call_operand.hbm [shape: bf16[5,128,128], index: 3, kind: input, shape index: {}]   ;;  %s1938_s4 = inlined_call_operand.vmem [shape: f32[5,1,128], index: 4, kind: input, shape index: {}]   ;;  %s1939_s5 = inlined_call_operand.vmem [shape: bf16[128,16], index: 5, kind: input, shape index: {}]   ;;  %s1940_s6 = inlined_call_operand.vmem [shape: f32[1,16], index: 6, kind: input, shape index: {}]   ;;  %s1941_s7 = inlined_call_operand.hbm [shape: f32[16,16], index: 7, kind: output, shape index: {}]  }
   0x1   :  { %13 = vsyncpa [#allocation4], 0 }
   0x2   :  { %15 = vsyncpa [#allocation4 + $0x1], 0  ;;  %s1694_s24 = smov 0   ;;  %s1696_s25 = smov 0  }
   0x3   :  { %s1698_s26 = smov 0   ;;  %s1700_s27 = smov 0  }
   0x4 LB: > { %s1715_s28 = sadd.s32 4294967295, %s1646_s27   ;;  %s1187_s29 = sadd.s32 4294967294, %s1646_s27   ;;  %s1646_s27 = sphi %s1700_s27, %s1949_s27   ;;  %s1642_s26 = sphi %s1698_s26, %s1948_s26   ;;  %s1638_s25 = sphi %s1696_s25, %s1947_s25   ;;  %s1634_s24 = sphi %s1694_s24, %s1946_s24  }
   0x5   : > { %s1719_s30 = sadd.s32 1, %s1646_s27   ;;  %s180_s8 = sadd.s32 1, %s1642_s26 }
   0x6   : > { %s177_s9 = ssub.s32 %s1646_s27, %s1719_s30  ;;  %p190_p0 = scmp.ne.s32.totalorder %s1642_s26, %s1638_s25 }
   0x7   : > { %p178_p1 = scmp.eq.s32.totalorder %s177_s9, 0  ;;  %p191_p2 = scmp.eq.s32.totalorder %s1715_s28, 1 }
   0x8   : > { %p196_p3 = scmp.ne.s32.totalorder %s1638_s25, %s1634_s24  ;;  %p197_p4 = scmp.eq.s32.totalorder %s1187_s29, 1 }
   0x9   : > { %s1730_s10 = scalar_select %p178_p1, %s1642_s26, %s180_s8  }
   0xa   : > { %p1732_p5 = por %p191_p2, %p190_p0  ;;  %p1736_p6 = por %p197_p4, %p196_p3 }
   0xb   : > { %p1188_p7 = scmp.ge.s32.totalorder %s1646_s27, 1  ;;  %p204_p8 = scmp.lt.s32.totalorder %s1646_s27, 3 }
   0xc   : > { %s1943_s12 = scalar_select %p1736_p6, 1, 0 }
   0xd   : > { %p1454_p9 = scmp.eq.s32.totalorder %s1715_s28, 0  ;;  %p1743_p10 = pnand %p1188_p7, %p204_p8 }
   0xe   : > { %s1648_s14 = smov [#allocation2]  }
   0xf   : > { %s222_s15 = sshll.u32 %s1648_s14, 4  ;;  %p1446_p11 = pneg %p1743_p10  ;;  %s223_s15 = int_to_ptr.vmem [resolvable:$true] %s222_s15 }
  0x10   : > { %s1567_s16 = scalar_lea.vmem %s223_s15, 5120  ;;  %p1575_p3 = scmp.lt.s32.totalorder %s223_s15, %s223_s15 }
  0x11   : > { %p1447_p12 = pnand %p1454_p9, %p1446_p11  ;;  %p1568_p0 = scmp.ne.s32.totalorder %s223_s15, %s1567_s16 }
  0x12   : > { %p1576_p4 = scmp.lt.s32.totalorder %s1567_s16, %s1567_s16 }
  0x13   : > { %p1558_p13 = pneg %p1447_p12 }
  0x14   : > { %p1577_p6 = por %p1576_p4, %p1575_p3 }
  0x15   : > { %p1570_p1 = pnand %p1568_p0, %p1558_p13 }
  0x17   : > { %p1571_p2 = pneg %p1570_p1 }
  0x19   : > { %p1578_p7 = pnand %p1577_p6, %p1571_p2 }
  0x1b   : > { %1581 = shalt.err (!%p1578_p7)
}
  0x1c   : > { %s1649_s17 = smov 64   ;;  %s1650_s18 = smov 4  }
  0x1d   : > { %1449 = dma.hbm_to_vmem [thread:$0]  (!%p1447_p12), %s1937_s3, 5120, %s223_s15, [#allocation3], %s1649_s17, %s1649_s17, %s1650_s18  }
  0x1e   : > { %254 = sbr.rel (%p1743_p10) target bundleno = 1581 (0x62d), region = 48 }
  0x23   : > { %1625 = dma.done.wait (%p1454_p9), [#allocation3], 5120  }
  0x24   : > { %1627 = vsyncadd (%p1454_p9), [#allocation3], 4294962176  ;;  %p285_p8 = scmp.lt.s32.totalorder %s1715_s28, 1  ;;  %v1651_v0 = vmov 0.0   ;;  %vm1652_vm0 = vmmov 0   ;;  %v1494_v1 = vld [vmem:[%s1935_s1 + $0x8] sm:$0xff]   ;;  %v359_v14 = vlaneseq }
  0x25   : > { %1312 = vmatprep.subr.bf16.mxu0 %v1651_v0  ;;  %1316 = vmatprep.mubr.msk.bf16.mxu0 %vm1652_vm0, %v1651_v0  ;;  %v1495_v2 = vld [vmem:[%s1935_s1] sm:$0xff]   ;;  %vm310_vm1 = vcmask 261120   ;;  %v1496_v4 = vld [vmem:[#allocation2 + $0x38] sm:$0xff]   ;;  %v1497_v6 = vld [vmem:[#allocation2 + $0x30] sm:$0xff]   ;;  %s282_s16 = sand.u32 1, %s1638_s25   ;;  %s1252_s20 = sshll.u32 %s1715_s28, 7 }
  0x26   : > { %s286_s21 = scalar_select %p285_p8, %s1715_s28, 1  ;;  %1320 = vmatprep.subr.bf16.mxu1 %v1651_v0  ;;  %1336 = vmatprep.mubr.msk.bf16.mxu1 %vm1652_vm0, %v1651_v0  ;;  %v1498_v7 = vld [vmem:[#allocation2 + $0x28] sm:$0xff]   ;;  %v1499_v8 = vld [vmem:[#allocation2 + $0x20] sm:$0xff]   ;;  %v1500_v9 = vld [vmem:[#allocation2 + $0x18] sm:$0xff]   ;;  %v360_v17 = vshrl.u32 %v359_v14, 7  ;;  %vm1100_vm2 = vcmask 130048  }
  0x27   : > { %1313 = vmatpush3.bf16.msra.mxu0 %v1494_v1  ;;  %1321 = vmatpush3.bf16.msra.mxu1 %v1496_v4  ;;  %v1501_v10 = vld [vmem:[#allocation2 + $0x10] sm:$0xff]   ;;  %v1502_v11 = vld [vmem:[#allocation2 + $0x8] sm:$0xff]   ;;  %v1503_v12 = vld [vmem:[#allocation2] sm:$0xff]   ;;  %s1193_s17 = sshll.u32 %s282_s16, 3  ;;  %s1103_s9 = scalar_lea.sflag [#allocation4], %s282_s16 }
  0x28   : > { %s1194_s22 = sshll.u32 %s286_s21, 3  ;;  %1314 = vmatprep.subr.bf16.mxu0 %v1651_v0  ;;  %1322 = vmatprep.subr.bf16.mxu1 %v1651_v0  ;;  %v1504_v13 = vld [vmem:[#allocation2 + $0x78] sm:$0xff]   ;;  %v297_v15 = vld [vmem:[%s1936_s2] sm:$0x1]  ;;  %v1793_v19 = vsub.s32 0, %v360_v17  ;;  %v1505_v34 = vld [vmem:[#allocation2 + $0x70] sm:$0xff]  }
  0x29   : > { %s288_s8 = scalar_lea.vmem %s1934_s0, %s1194_s22  ;;  %v355_v16 = vpack.c.bf16 %v297_v15, %v297_v15  ;;  %v1506_v35 = vld [vmem:[#allocation2 + $0x68] sm:$0xff]   ;;  %v1507_v36 = vld [vmem:[#allocation2 + $0x60] sm:$0xff]   ;;  %v1508_v37 = vld [vmem:[#allocation2 + $0x58] sm:$0xff]   ;;  %s284_s21 = scalar_lea.vmem [#allocation5], %s1193_s17 }
  0x2a   : > { %v291_v3 = vld [vmem:[%s288_s8] sm:$0xff]  ;;  %v1509_v38 = vld [vmem:[#allocation2 + $0x50] sm:$0xff]   ;;  %v1510_v39 = vld [vmem:[#allocation2 + $0x48] sm:$0xff]   ;;  %s1116_s22 = sshll.u32 %s284_s21, 4  ;;  %s1893_s8 = scalar_lea.hbm %s1941_s7, %s1252_s20  ;;  %s1895_s22 = int_to_ptr.vmem [resolvable:$true] %s1116_s22 }
  0x2b   : > { %v292_v5 = vpack.c.bf16 %v291_v3, %v291_v3  ;;  %1315 = vmatpush3.bf16.msra.mxu0 %v1495_v2  ;;  %1323 = vmatpush3.bf16.msra.mxu1 %v1497_v6  ;;  %v357_v18 = vpack.i.b16 %v355_v16, %v355_v16  ;;  %v1511_v40 = vld [vmem:[#allocation2 + $0x40] sm:$0xff]   ;;  %v1512_v41 = vld [vmem:[#allocation2 + $0xb8] sm:$0xff]   ;;  %v1513_v59 = vld [vmem:[#allocation2 + $0xb0] sm:$0xff]   ;;  %s1582_s28 = scalar_lea.vmem %s1895_s22, 128  ;;  %s1653_s13 = smov [#allocation5]  }
  0x2c   : > { %1340 = vmatprep.subr.bf16.mxu0 %v1651_v0  ;;  %1324 = vmatprep.subr.bf16.mxu1 %v1651_v0  ;;  %v387_v42 = vld [vmem:[%s1938_s4] sm:$0x1]  ;;  %v1514_v60 = vld [vmem:[#allocation2 + $0xa8] sm:$0xff]   ;;  %v1516_v62 = vld [vmem:[#allocation2 + $0x98] sm:$0xff]   ;;  %p1583_p6 = scmp.ne.s32.totalorder %s1895_s22, %s1582_s28  ;;  %s1586_s14 = sshll.u32 %s1653_s13, 4  ;;  %s1587_s14 = int_to_ptr.vmem [resolvable:$false] %s1586_s14 }
  0x2d   : > { %v362_v20 = vrot.slane %v357_v18, %v1793_v19  ;;  %v477_v43 = vpack.c.bf16 %v387_v42, %v387_v42  ;;  %v1515_v61 = vld [vmem:[#allocation2 + $0xa0] sm:$0xff]   ;;  %v1517_v63 = vld [vmem:[#allocation2 + $0x90] sm:$0xff]   ;;  %v1518_v1 = vld [vmem:[#allocation2 + $0x88] sm:$0xff]   ;;  %s1588_s15 = scalar_lea.vmem %s1587_s14, 256  ;;  %p1589_p11 = scmp.lt.s32.totalorder %s1895_s22, %s1587_s14 }
  0x2e   : > { %1317 = vmatmul.mubr.msk.bf16.vlgmr.msra.gmra.mxu0 %vm310_vm1, %v292_v5  ;;  %v1519_v2 = vld [vmem:[#allocation2 + $0x80] sm:$0xff]   ;;  %v1520_v3 = vld [vmem:[#allocation2 + $0xf8] sm:$0xff]   ;;  %p1584_p9 = pnand %p1583_p6, %p1732_p5  ;;  %p1590_p12 = scmp.lt.s32.totalorder %s1588_s15, %s1582_s28 }
  0x2f   : > { %1356 = vmatprep.mubr.msk.bf16.mxu0 %vm1652_vm0, %v1651_v0  ;;  %1325 = vmatpush3.bf16.msra.mxu1 %v1498_v7  ;;  %v479_v44 = vpack.i.b16 %v477_v43, %v477_v43  ;;  %v1206_v4 = vld [vmem:[%s1938_s4 + $0x1] sm:$0x1] }
  0x30   : > { %1326 = vmatprep.subr.bf16.mxu1 %v1651_v0  ;;  %1341 = vmatpush3.bf16.msra.mxu0 %v1504_v13  ;;  %v601_v5 = vpack.c.bf16 %v1206_v4, %v1206_v4  ;;  %p1585_p10 = pneg %p1584_p9  ;;  %p1591_p13 = por %p1590_p12, %p1589_p11 }
  0x31   : > { %1342 = vmatprep.subr.bf16.mxu0 %v1651_v0  ;;  %v484_v45 = vrot.slane %v479_v44, %v1793_v19 }
  0x32   : > { %v603_v6 = vpack.i.b16 %v601_v5, %v601_v5  ;;  %p1592_p0 = pnand %p1591_p13, %p1585_p10 }
  0x33   : > { %1327 = vmatpush3.bf16.msra.mxu1 %v1499_v8 }
  0x34   : > { %1328 = vmatprep.subr.bf16.mxu1 %v1651_v0  ;;  %1343 = vmatpush3.bf16.msra.mxu0 %v1505_v34  ;;  %v608_v7 = vrot.slane %v603_v6, %v1793_v19 }
  0x35   : > { %1344 = vmatprep.subr.bf16.mxu0 %v1651_v0 }
  0x37   : > { %1329 = vmatpush3.bf16.msra.mxu1 %v1500_v9 }
  0x38   : > { %1330 = vmatprep.subr.bf16.mxu1 %v1651_v0  ;;  %1345 = vmatpush3.bf16.msra.mxu0 %v1506_v35 }
  0x39   : > { %1346 = vmatprep.subr.bf16.mxu0 %v1651_v0 }
  0x3b   : > { %1331 = vmatpush3.bf16.msra.mxu1 %v1501_v10 }
  0x3c   : > { %1332 = vmatprep.subr.bf16.mxu1 %v1651_v0  ;;  %1347 = vmatpush3.bf16.msra.mxu0 %v1507_v36 }
  0x3d   : > { %1348 = vmatprep.subr.bf16.mxu0 %v1651_v0 }
  0x3f   : > { %1333 = vmatpush3.bf16.msra.mxu1 %v1502_v11 }
  0x40   : > { %1334 = vmatprep.subr.bf16.mxu1 %v1651_v0  ;;  %1349 = vmatpush3.bf16.msra.mxu0 %v1508_v37 }
  0x41   : > { %1350 = vmatprep.subr.bf16.mxu0 %v1651_v0 }
  0x43   : > { %1335 = vmatpush3.bf16.msra.mxu1 %v1503_v12 }
  0x44   : > { %1360 = vmatprep.subr.bf16.mxu1 %v1651_v0  ;;  %1351 = vmatpush3.bf16.msra.mxu0 %v1509_v38 }
  0x45   : > { %1352 = vmatprep.subr.bf16.mxu0 %v1651_v0 }
  0x48   : > { %1353 = vmatpush3.bf16.msra.mxu0 %v1510_v39 }
  0x49   : > { %1354 = vmatprep.subr.bf16.mxu0 %v1651_v0 }
  0x4c   : > { %1355 = vmatpush3.bf16.msra.mxu0 %v1511_v40 }
  0x4d   : > { %1380 = vmatprep.subr.bf16.mxu0 %v1651_v0 }
  0xee   : > { %v348_v21 = vpop.f32.mrf.mxu0 }
  0xef   : > { %v354_v22 = vpack.c.bf16 %v348_v21, %v348_v21 }
  0xf0   : > { %v1318_v23 = vpop.f32.mrf.mxu0 }
  0xf1   : > { %v363_v24 = vadd.bf16 %v362_v20, %v354_v22  ;;  %v1521_v22 = vld [vmem:[#allocation2 + $0xf0] sm:$0xff]   ;;  %v1522_v23 = vld [vmem:[#allocation2 + $0xe8] sm:$0xff]  }
  0xf2   : > { %v351_v25 = vpop.f32.mrf.mxu0 }
  0xf3   : > { %v364_v26 = vunpack.c.l.bf16 %v363_v24  ;;  %v367_v31 = vmul.bf16 1056980736, %v363_v24  ;;  %v1523_v24 = vld [vmem:[#allocation2 + $0xe0] sm:$0xff]   ;;  %v1524_v25 = vld [vmem:[#allocation2 + $0xd8] sm:$0xff]  }
  0xf4   : > { %v1319_v27 = vpop.f32.mrf.mxu0 }
  0xf5   : > { %v365_v28 = vmul.f32 0.70710677, %v364_v26  ;;  %v1525_v26 = vld [vmem:[#allocation2 + $0xd0] sm:$0xff]   ;;  %v1526_v27 = vld [vmem:[#allocation2 + $0xc8] sm:$0xff]  }
  0xf7   : > { %1544 = verf.f32 %v365_v28  ;;  %v1527_v28 = vld [vmem:[#allocation2 + $0xc0] sm:$0xff]  }
 0x104   : > { %v1545_v29 = vpop.eup %1544 }
 0x105   : > { %v368_v30 = vadd.f32 1.0, %v1545_v29  ;;  %v1528_v29 = vld [vmem:[#allocation2 + $0x138] sm:$0xff]  }
 0x107   : > { %v369_v32 = vpack.c.bf16 %v368_v30, %v368_v30  ;;  %v1215_v30 = vld [vmem:[%s1938_s4 + $0x2] sm:$0x1] }
 0x109   : > { %v370_v33 = vmul.bf16 %v369_v32, %v367_v31  ;;  %v725_v31 = vpack.c.bf16 %v1215_v30, %v1215_v30 }
 0x10b   : > { %1337 = vmatmul.mubr.bf16.vlgmr.msra.gmra.mxu1 %v370_v33  ;;  %v727_v32 = vpack.i.b16 %v725_v31, %v725_v31 }
 0x10c   : > { %1376 = vmatprep.mubr.msk.bf16.mxu1 %vm1652_vm0, %v1651_v0  ;;  %1361 = vmatpush3.bf16.msra.mxu1 %v1512_v41 }
 0x10d   : > { %1362 = vmatprep.subr.bf16.mxu1 %v1651_v0  ;;  %v732_v33 = vrot.slane %v727_v32, %v1793_v19 }
 0x110   : > { %1363 = vmatpush3.bf16.msra.mxu1 %v1513_v59 }
 0x111   : > { %1364 = vmatprep.subr.bf16.mxu1 %v1651_v0 }
 0x114   : > { %1365 = vmatpush3.bf16.msra.mxu1 %v1514_v60 }
 0x115   : > { %1366 = vmatprep.subr.bf16.mxu1 %v1651_v0 }
 0x118   : > { %1367 = vmatpush3.bf16.msra.mxu1 %v1515_v61 }
 0x119   : > { %1368 = vmatprep.subr.bf16.mxu1 %v1651_v0 }
 0x11c   : > { %1369 = vmatpush3.bf16.msra.mxu1 %v1516_v62 }
 0x11d   : > { %1370 = vmatprep.subr.bf16.mxu1 %v1651_v0 }
 0x120   : > { %1371 = vmatpush3.bf16.msra.mxu1 %v1517_v63 }
 0x121   : > { %1372 = vmatprep.subr.bf16.mxu1 %v1651_v0 }
 0x124   : > { %1373 = vmatpush3.bf16.msra.mxu1 %v1518_v1 }
 0x125   : > { %1374 = vmatprep.subr.bf16.mxu1 %v1651_v0 }
 0x128   : > { %1375 = vmatpush3.bf16.msra.mxu1 %v1519_v2 }
 0x129   : > { %1400 = vmatprep.subr.bf16.mxu1 %v1651_v0 }
 0x1cb   : > { %v470_v46 = vpop.f32.mrf.mxu1 }
 0x1cc   : > { %v476_v47 = vpack.c.bf16 %v470_v46, %v470_v46 }
 0x1cd   : > { %v1338_v48 = vpop.f32.mrf.mxu1 }
 0x1ce   : > { %v485_v49 = vadd.bf16 %v484_v45, %v476_v47  ;;  %v1529_v47 = vld [vmem:[#allocation2 + $0x130] sm:$0xff]   ;;  %v1530_v48 = vld [vmem:[#allocation2 + $0x128] sm:$0xff]  }
 0x1cf   : > { %v473_v50 = vpop.f32.mrf.mxu1 }
 0x1d0   : > { %v486_v51 = vunpack.c.l.bf16 %v485_v49  ;;  %v489_v56 = vmul.bf16 1056980736, %v485_v49  ;;  %v1531_v49 = vld [vmem:[#allocation2 + $0x120] sm:$0xff]   ;;  %v1532_v50 = vld [vmem:[#allocation2 + $0x118] sm:$0xff]  }
 0x1d1   : > { %v1339_v52 = vpop.f32.mrf.mxu1 }
 0x1d2   : > { %v487_v53 = vmul.f32 0.70710677, %v486_v51  ;;  %v1533_v51 = vld [vmem:[#allocation2 + $0x110] sm:$0xff]   ;;  %v1534_v52 = vld [vmem:[#allocation2 + $0x108] sm:$0xff]  }
 0x1d4   : > { %1546 = verf.f32 %v487_v53  ;;  %v1535_v53 = vld [vmem:[#allocation2 + $0x100] sm:$0xff]  }
 0x1e1   : > { %v1547_v54 = vpop.eup %1546 }
 0x1e2   : > { %v490_v55 = vadd.f32 1.0, %v1547_v54  ;;  %v1536_v54 = vld [vmem:[%s1939_s5 + $0x38] sm:$0xff]  }
 0x1e4   : > { %v491_v57 = vpack.c.bf16 %v490_v55, %v490_v55  ;;  %v1224_v55 = vld [vmem:[%s1938_s4 + $0x3] sm:$0x1] }
 0x1e6   : > { %v492_v58 = vmul.bf16 %v491_v57, %v489_v56  ;;  %v849_v56 = vpack.c.bf16 %v1224_v55, %v1224_v55 }
 0x1e8   : > { %1357 = vmatmul.mubr.bf16.vlgmr.msra.gmra.mxu0 %v492_v58  ;;  %v851_v57 = vpack.i.b16 %v849_v56, %v849_v56 }
 0x1e9   : > { %1396 = vmatprep.mubr.msk.bf16.mxu0 %vm1652_vm0, %v1651_v0  ;;  %1381 = vmatpush3.bf16.msra.mxu0 %v1520_v3 }
 0x1ea   : > { %1382 = vmatprep.subr.bf16.mxu0 %v1651_v0  ;;  %v856_v58 = vrot.slane %v851_v57, %v1793_v19 }
 0x1ed   : > { %1383 = vmatpush3.bf16.msra.mxu0 %v1521_v22 }
 0x1ee   : > { %1384 = vmatprep.subr.bf16.mxu0 %v1651_v0 }
 0x1f1   : > { %1385 = vmatpush3.bf16.msra.mxu0 %v1522_v23 }
 0x1f2   : > { %1386 = vmatprep.subr.bf16.mxu0 %v1651_v0 }
 0x1f5   : > { %1387 = vmatpush3.bf16.msra.mxu0 %v1523_v24 }
 0x1f6   : > { %1388 = vmatprep.subr.bf16.mxu0 %v1651_v0 }
 0x1f9   : > { %1389 = vmatpush3.bf16.msra.mxu0 %v1524_v25 }
 0x1fa   : > { %1390 = vmatprep.subr.bf16.mxu0 %v1651_v0 }
 0x1fd   : > { %1391 = vmatpush3.bf16.msra.mxu0 %v1525_v26 }
 0x1fe   : > { %1392 = vmatprep.subr.bf16.mxu0 %v1651_v0 }
 0x201   : > { %1393 = vmatpush3.bf16.msra.mxu0 %v1526_v27 }
 0x202   : > { %1394 = vmatprep.subr.bf16.mxu0 %v1651_v0 }
 0x205   : > { %1395 = vmatpush3.bf16.msra.mxu0 %v1527_v28 }
 0x206   : > { %1420 = vmatprep.subr.bf16.mxu0 %v1651_v0 }
 0x2a8   : > { %v594_v8 = vpop.f32.mrf.mxu0 }
 0x2a9   : > { %v600_v9 = vpack.c.bf16 %v594_v8, %v594_v8 }
 0x2aa   : > { %v1358_v10 = vpop.f32.mrf.mxu0 }
 0x2ab   : > { %v609_v11 = vadd.bf16 %v608_v7, %v600_v9  ;;  %v1537_v9 = vld [vmem:[%s1939_s5 + $0x30] sm:$0xff]   ;;  %v1538_v10 = vld [vmem:[%s1939_s5 + $0x28] sm:$0xff]  }
 0x2ac   : > { %v597_v12 = vpop.f32.mrf.mxu0 }
 0x2ad   : > { %v610_v13 = vunpack.c.l.bf16 %v609_v11  ;;  %v613_v18 = vmul.bf16 1056980736, %v609_v11  ;;  %v1539_v11 = vld [vmem:[%s1939_s5 + $0x20] sm:$0xff]   ;;  %v1540_v12 = vld [vmem:[%s1939_s5 + $0x18] sm:$0xff]  }
 0x2ae   : > { %v1359_v14 = vpop.f32.mrf.mxu0 }
 0x2af   : > { %v611_v15 = vmul.f32 0.70710677, %v610_v13  ;;  %v1541_v13 = vld [vmem:[%s1939_s5 + $0x10] sm:$0xff]   ;;  %v1542_v14 = vld [vmem:[%s1939_s5 + $0x8] sm:$0xff]  }
 0x2b1   : > { %1548 = verf.f32 %v611_v15  ;;  %v1543_v15 = vld [vmem:[%s1939_s5] sm:$0xff]  }
 0x2be   : > { %v1549_v16 = vpop.eup %1548 }
 0x2bf   : > { %v614_v17 = vadd.f32 1.0, %v1549_v16  ;;  %v1233_v16 = vld [vmem:[%s1938_s4 + $0x4] sm:$0x1] }
 0x2c1   : > { %v615_v20 = vpack.c.bf16 %v614_v17, %v614_v17  ;;  %v973_v17 = vpack.c.bf16 %v1233_v16, %v1233_v16 }
 0x2c3   : > { %v616_v21 = vmul.bf16 %v615_v20, %v613_v18  ;;  %v975_v18 = vpack.i.b16 %v973_v17, %v973_v17 }
 0x2c5   : > { %1377 = vmatmul.mubr.bf16.vlgmr.msra.gmra.mxu1 %v616_v21  ;;  %v980_v20 = vrot.slane %v975_v18, %v1793_v19  ;;  %v1242_v19 = vld [vmem:[%s1940_s6] ss:$0 sm:$0xff] }
 0x2c6   : > { %1416 = vmatprep.mubr.msk.bf16.mxu1 %vm1652_vm0, %v1651_v0  ;;  %1401 = vmatpush3.bf16.msra.mxu1 %v1528_v29 }
 0x2c7   : > { %1402 = vmatprep.subr.bf16.mxu1 %v1651_v0 }
 0x2ca   : > { %1403 = vmatpush3.bf16.msra.mxu1 %v1529_v47 }
 0x2cb   : > { %1404 = vmatprep.subr.bf16.mxu1 %v1651_v0 }
 0x2ce   : > { %1405 = vmatpush3.bf16.msra.mxu1 %v1530_v48 }
 0x2cf   : > { %1406 = vmatprep.subr.bf16.mxu1 %v1651_v0 }
 0x2d2   : > { %1407 = vmatpush3.bf16.msra.mxu1 %v1531_v49 }
 0x2d3   : > { %1408 = vmatprep.subr.bf16.mxu1 %v1651_v0 }
 0x2d6   : > { %1409 = vmatpush3.bf16.msra.mxu1 %v1532_v50 }
 0x2d7   : > { %1410 = vmatprep.subr.bf16.mxu1 %v1651_v0 }
 0x2da   : > { %1411 = vmatpush3.bf16.msra.mxu1 %v1533_v51 }
 0x2db   : > { %1412 = vmatprep.subr.bf16.mxu1 %v1651_v0 }
 0x2de   : > { %1413 = vmatpush3.bf16.msra.mxu1 %v1534_v52 }
 0x2df   : > { %1414 = vmatprep.subr.bf16.mxu1 %v1651_v0 }
 0x2e2   : > { %1415 = vmatpush3.bf16.msra.mxu1 %v1535_v53 }
 0x385   : > { %v718_v34 = vpop.f32.mrf.mxu1 }
 0x386   : > { %v724_v35 = vpack.c.bf16 %v718_v34, %v718_v34 }
 0x387   : > { %v1378_v36 = vpop.f32.mrf.mxu1 }
 0x388   : > { %v733_v37 = vadd.bf16 %v732_v33, %v724_v35 }
 0x389   : > { %v721_v38 = vpop.f32.mrf.mxu1 }
 0x38a   : > { %v734_v39 = vunpack.c.l.bf16 %v733_v37  ;;  %v737_v44 = vmul.bf16 1056980736, %v733_v37 }
 0x38b   : > { %v1379_v40 = vpop.f32.mrf.mxu1 }
 0x38c   : > { %v735_v41 = vmul.f32 0.70710677, %v734_v39 }
 0x38e   : > { %1550 = verf.f32 %v735_v41 }
 0x39b   : > { %v1551_v42 = vpop.eup %1550 }
 0x39c   : > { %v738_v43 = vadd.f32 1.0, %v1551_v42 }
 0x39e   : > { %v739_v45 = vpack.c.bf16 %v738_v43, %v738_v43 }
 0x3a0   : > { %v740_v46 = vmul.bf16 %v739_v45, %v737_v44 }
 0x3a2   : > { %1397 = vmatmul.mubr.bf16.vlgmr.msra.gmra.mxu0 %v740_v46 }
 0x3a3   : > { %1436 = vmatprep.mubr.msk.bf16.mxu0 %vm1652_vm0, %v1651_v0  ;;  %1421 = vmatpush3.bf16.msra.mxu0 %v1536_v54 }
 0x3a4   : > { %1422 = vmatprep.subr.bf16.mxu0 %v1651_v0 }
 0x3a7   : > { %1423 = vmatpush3.bf16.msra.mxu0 %v1537_v9 }
 0x3a8   : > { %1424 = vmatprep.subr.bf16.mxu0 %v1651_v0 }
 0x3ab   : > { %1425 = vmatpush3.bf16.msra.mxu0 %v1538_v10 }
 0x3ac   : > { %1426 = vmatprep.subr.bf16.mxu0 %v1651_v0 }
 0x3af   : > { %1427 = vmatpush3.bf16.msra.mxu0 %v1539_v11 }
 0x3b0   : > { %1428 = vmatprep.subr.bf16.mxu0 %v1651_v0 }
 0x3b3   : > { %1429 = vmatpush3.bf16.msra.mxu0 %v1540_v12 }
 0x3b4   : > { %1430 = vmatprep.subr.bf16.mxu0 %v1651_v0 }
 0x3b7   : > { %1431 = vmatpush3.bf16.msra.mxu0 %v1541_v13 }
 0x3b8   : > { %1432 = vmatprep.subr.bf16.mxu0 %v1651_v0 }
 0x3bb   : > { %1433 = vmatpush3.bf16.msra.mxu0 %v1542_v14 }
 0x3bc   : > { %1434 = vmatprep.subr.bf16.mxu0 %v1651_v0 }
 0x3bf   : > { %1435 = vmatpush3.bf16.msra.mxu0 %v1543_v15 }
 0x462   : > { %v842_v59 = vpop.f32.mrf.mxu0 }
 0x463   : > { %v848_v60 = vpack.c.bf16 %v842_v59, %v842_v59 }
 0x464   : > { %v1398_v61 = vpop.f32.mrf.mxu0 }
 0x465   : > { %v857_v62 = vadd.bf16 %v856_v58, %v848_v60 }
 0x466   : > { %v845_v63 = vpop.f32.mrf.mxu0 }
 0x467   : > { %v858_v1 = vunpack.c.l.bf16 %v857_v62  ;;  %v861_v6 = vmul.bf16 1056980736, %v857_v62 }
 0x468   : > { %v1399_v2 = vpop.f32.mrf.mxu0 }
 0x469   : > { %v859_v3 = vmul.f32 0.70710677, %v858_v1 }
 0x46b   : > { %1552 = verf.f32 %v859_v3 }
 0x478   : > { %v1553_v4 = vpop.eup %1552 }
 0x479   : > { %v862_v5 = vadd.f32 1.0, %v1553_v4 }
 0x47b   : > { %v863_v7 = vpack.c.bf16 %v862_v5, %v862_v5 }
 0x47d   : > { %v864_v8 = vmul.bf16 %v863_v7, %v861_v6 }
 0x47f   : > { %1417 = vmatmul.mubr.bf16.vlgmr.msra.gmra.mxu1 %v864_v8 }
 0x53f   : > { %v966_v21 = vpop.f32.mrf.mxu1 }
 0x540   : > { %v972_v22 = vpack.c.bf16 %v966_v21, %v966_v21 }
 0x541   : > { %v1418_v23 = vpop.f32.mrf.mxu1 }
 0x542   : > { %v981_v24 = vadd.bf16 %v980_v20, %v972_v22 }
 0x543   : > { %v969_v0 = vpop.f32.mrf.mxu1 }
 0x544   : > { %v982_v25 = vunpack.c.l.bf16 %v981_v24  ;;  %v985_v30 = vmul.bf16 1056980736, %v981_v24 }
 0x545   : > { %v1419_v26 = vpop.f32.mrf.mxu1 }
 0x546   : > { %v983_v27 = vmul.f32 0.70710677, %v982_v25 }
 0x548   : > { %1554 = verf.f32 %v983_v27 }
 0x555   : > { %v1555_v28 = vpop.eup %1554 }
 0x556   : > { %v986_v29 = vadd.f32 1.0, %v1555_v28 }
 0x558   : > { %v987_v31 = vpack.c.bf16 %v986_v29, %v986_v29 }
 0x55a   : > { %v988_v32 = vmul.bf16 %v987_v31, %v985_v30 }
 0x55c   : > { %1437 = vmatmul.mubr.bf16.vlgmr.msra.gmra.mxu0 %v988_v32 }
 0x61c   : > { %v1094_v33 = vpop.f32.mrf.mxu0 }
 0x61d   : > { %v1095_v34 = vadd.f32 %v1242_v19, %v1094_v33 }
 0x61e   : > { %v1438_v35 = vpop.f32.mrf.mxu0 }
 0x61f   : > { %1101 = vst.msk [vmem:[%s284_s21] sm:$0xff] %vm1100_vm2, %v1095_v34 }
 0x620   : > { %v1097_v36 = vpop.f32.mrf.mxu0 }
 0x621   : > { %1595 = shalt.err (!%p1592_p0)
}
 0x622   : > { %s1596_s17 = scalar_lea.hbm %s1893_s8, 128  ;;  %s1600_s19 = scalar_lea.hbm %s1941_s7, 256 }
 0x623   : > { %p1597_p1 = scmp.ne.s32.totalorder %s1893_s8, %s1596_s17  ;;  %p1601_p4 = scmp.lt.s32.totalorder %s1893_s8, %s1941_s7 }
 0x624   : > { %p1602_p7 = scmp.lt.s32.totalorder %s1600_s19, %s1596_s17 }
 0x625   : > { %p1598_p2 = pnand %p1597_p1, %p1732_p5 }
 0x626   : > { %p1603_p8 = por %p1602_p7, %p1601_p4 }
 0x627   : > { %p1599_p3 = pneg %p1598_p2 }
 0x629   : > { %p1604_p6 = pnand %p1603_p8, %p1599_p3 }
 0x62b   : > { %1607 = shalt.err (!%p1604_p6)
}
 0x62c   : > { %1444 = dma.vmem_to_hbm [thread:$0]  (%p1732_p5), %s1895_s22, 128, %s1893_s8, %s1103_s9   ;;  %v1439_v37 = vpop.f32.mrf.mxu0 }
 0x62d PF: > { %p1456_p9 = scmp.ge.s32.totalorder %s1646_s27, 2  ;;  %s1128_s23 = sand.u32 1, %s1634_s24  }
 0x62e   : > { %p1945_p10 = scmp.ne.s32.totalorder %s1943_s12, 0  ;;  %s1129_s29 = scalar_lea.sflag [#allocation4], %s1128_s23 }
 0x630   : > { %p1451_p11 = pnand %p1456_p9, %p1945_p10 }
 0x632   : > { %p1452_p12 = pneg %p1451_p11 }
 0x634   : > { %1629 = dma.done.wait (%p1452_p12), %s1129_s29, 128  }
 0x635   : > { %1631 = vsyncadd (%p1452_p12), %s1129_s29, 4294967168  ;;  %p18_p13 = scmp.ge.s32.totalorder %s1719_s30, 4   ;;  %s1946_s24 = smov %s1638_s25 }
 0x636   : > { %s1947_s25 = smov %s1642_s26  ;;  %s1948_s26 = smov %s1730_s10 }
 0x637   : > { %s1949_s27 = smov %s1719_s30  ;;  %20 = sbr.rel (!%p18_p13) target bundleno = 4 (0x4), region = 96 }
 0x63c   :  { %1134 = vsyncpa [#allocation3], 1 }
 0x63d   :  { %1136 = vsyncpa [#allocation3 + $0x1], 1 }
 0x63e   :  { %1137 = vsyncpa [#allocation4], 1 }
 0x63f   :  { %1139 = vsyncpa [#allocation4 + $0x1], 1 }

</bundles_post_ra>
